<compile_context>
chip_gen: v5e
topology: v5e:2x2
jax: 0.10.0
libtpu: 0.0.40
codegen_flags: <defaults>
</compile_context>

<pallas_src>
import functools

import jax
import jax.numpy as jnp
from jax.experimental import pallas as pl
from jax.experimental.pallas import tpu as pltpu

F_PAD = 16  # packed per-point input: [xyz(3), intensity(1), cluster(3), vcenter(3), 0-pad(6)]


# ----------------------------------------------------------------------------
# Kernel A: fused per-point VFE layer: Linear(10,64,bias=False) + BN1d + ReLU.
#   Input is a lane-co-packed [BLK, 16] slab; the cluster-center / voxel-center
#   offsets are folded into a recombined weight (see wrapper), so the kernel is
#   one MXU matmul + VPU scale/bias/ReLU.
# ----------------------------------------------------------------------------
def _point_vfe_kernel(x_ref, w_ref, scale_ref, bias_ref, o_ref):
    h = jnp.dot(x_ref[...], w_ref[...], preferred_element_type=jnp.float32)
    h = h * scale_ref[...] + bias_ref[...]        # BN1d (eval) folded into scale/bias
    o_ref[...] = jnp.maximum(h, 0.0)              # ReLU


# ----------------------------------------------------------------------------
# Kernel B: per-voxel max over point features (reduce_op='max').
#   Points are pre-sorted by voxel id, so voxel block [m0, m0+BM) owns the
#   contiguous point range [seg[m0], seg[m0+BM)).  The point features stay in
#   HBM (memory_space=pl.ANY); the kernel streams that range in fixed-size,
#   chunk-aligned pieces with manual DMA, max-reduces each voxel row into a
#   VMEM scratch accumulator, and writes the output tile once per block.
# ----------------------------------------------------------------------------
def _seg_max_kernel(seg_ref, pf_hbm, out_ref, buf_ref, acc_ref, sem_ref, *,
                    block_m, chunk):
    i = pl.program_id(0)
    m0 = i * block_m
    start = seg_ref[m0]
    end = seg_ref[m0 + block_m]
    first = start // chunk
    n_chunks = jnp.where(end > start, (end - 1) // chunk + 1 - first, 0)

    acc_ref[...] = jnp.full_like(acc_ref, -jnp.inf)

    def chunk_body(t, carry):
        base = pl.multiple_of((first + t) * chunk, chunk)
        # NOTE: single-buffered DMA; the per-chunk masked reduction dominates the
        #       64 KiB copy here, so double buffering is left as a follow-up.
        cp = pltpu.make_async_copy(pf_hbm.at[pl.ds(base, chunk)], buf_ref, sem_ref)
        cp.start()
        cp.wait()
        pf = buf_ref[...]                                              # [chunk, C]
        pidx = base + jax.lax.broadcasted_iota(jnp.int32, (chunk, 1), 0)

        def row_body(r, c):
            lo = seg_ref[m0 + r]
            hi = seg_ref[m0 + r + 1]

            # sorted data => skip rows whose segment does not touch this chunk
            @pl.when(jnp.logical_and(hi > base, lo < base + chunk))
            def _():
                msk = jnp.logical_and(pidx >= lo, pidx < hi)           # [chunk, 1]
                rmax = jnp.max(jnp.where(msk, pf, -jnp.inf), axis=0, keepdims=True)
                acc_ref[pl.ds(r, 1), :] = jnp.maximum(acc_ref[pl.ds(r, 1), :], rmax)

            return c

        jax.lax.fori_loop(0, block_m, row_body, 0)
        return carry

    jax.lax.fori_loop(0, n_chunks, chunk_body, 0)
    out_ref[...] = acc_ref[...]                    # single full-tile store per block


# ----------------------------------------------------------------------------
# Wrapper: dynamic scatter bookkeeping (XLA glue) + the two Pallas kernels.
# ----------------------------------------------------------------------------
def dynamic_vfe_forward(features, coors, W, bn_gamma, bn_beta, bn_mean, bn_var,
                        voxel_size=(0.2, 0.2, 4.0),
                        point_cloud_range=(0.0, -40.0, -3.0, 70.4, 40.0, 1.0),
                        eps=1e-3,
                        point_block=512, voxel_block=128, chunk=256,
                        vmem_limit_bytes=32 * 1024 * 1024):
    N, c_in = features.shape
    assert c_in == 4
    f32 = jnp.float32
    features = features.astype(f32)
    xyz = features[:, :3]
    intensity = features[:, 3:]
    c_out = W.shape[1]

    blk = min(point_block, N)
    assert N % blk == 0 and N % chunk == 0 and N % voxel_block == 0, \
        "pad the point cloud so N is a multiple of the block / chunk sizes"

    vx, vy, vz = voxel_size
    x0, y0, z0, x1, y1, z1 = point_cloud_range
    Dx = int(round((x1 - x0) / vx))
    Dy = int(round((y1 - y0) / vy))
    Dz = int(round((z1 - z0) / vz))

    # --- dynamic scatter: unique voxels + dense per-point voxel id ---
    c = coors.astype(jnp.int32)
    valid_pt = jnp.all(c >= 0, axis=1)       # out-of-range points (coor == -1) are isolated
    keys = ((c[:, 0] * Dz + c[:, 1]) * Dy + c[:, 2]) * Dx + c[:, 3]
    invalid_key = jnp.int32(2 ** 30)
    fill_key = jnp.iinfo(jnp.int32).max
    keys = jnp.where(valid_pt, keys, invalid_key)
    uniq, inv = jnp.unique(keys, return_inverse=True, size=N, fill_value=fill_key)
    voxel_id = inv.reshape(-1).astype(jnp.int32)                       # dense ids
    voxel_valid = jnp.logical_and(uniq != fill_key, uniq != invalid_key)
    num_voxels = jnp.sum(voxel_valid.astype(jnp.int32))

    # decode unique keys back to (batch, z, y, x); invalid/padded rows -> -1
    kx = uniq % Dx
    r = uniq // Dx
    ky = r % Dy
    r = r // Dy
    kz = r % Dz
    kb = r // Dz
    voxel_coors = jnp.stack([kb, kz, ky, kx], axis=-1).astype(jnp.int32)
    voxel_coors = jnp.where(voxel_valid[:, None], voxel_coors, -1)

    # --- per-voxel cluster center (mean of xyz): O(N) segment-sum (XLA) ---
    sums = jax.ops.segment_sum(
        jnp.concatenate([xyz, jnp.ones((N, 1), f32)], axis=-1), voxel_id,
        num_segments=N)
    cluster_center = sums[:, :3] / jnp.maximum(sums[:, 3:4], 1.0)      # [M_pad, 3]
    cc_pt = jnp.take(cluster_center, voxel_id, axis=0)                 # [N, 3] gather

    # per-point voxel center
    voxel_center = jnp.stack(
        [(c[:, 3].astype(f32) + 0.5) * vx + x0,
         (c[:, 2].astype(f32) + 0.5) * vy + y0,
         (c[:, 1].astype(f32) + 0.5) * vz + z0], axis=-1)              # [N, 3]

    # --- sort points by voxel id so each voxel's points are contiguous ---
    order = jnp.argsort(voxel_id)
    vid_s = voxel_id[order]
    seg_start = jnp.searchsorted(vid_s, jnp.arange(N + 1, dtype=jnp.int32),
                                 side='left').astype(jnp.int32)        # [M_pad + 1]

    # --- lane-co-packed per-point slab + recombined weight ---
    # feat10 @ W = [xyz, xyz-cc, xyz-vc, int] @ [Wx; Wc; Wv; Wi]
    #            = [xyz, int, cc, vc] @ [[Wx+Wc+Wv], [Wi], [-Wc], [-Wv]]
    packed = jnp.concatenate(
        [xyz, intensity, cc_pt, voxel_center, jnp.zeros((N, F_PAD - 10), f32)],
        axis=-1)[order]                                                # [N, 16] sorted
    W = W.astype(f32)
    Wx, Wc, Wv, Wi = W[0:3], W[3:6], W[6:9], W[9:10]
    W_packed = jnp.concatenate(
        [Wx + Wc + Wv, Wi, -Wc, -Wv, jnp.zeros((F_PAD - 10, c_out), f32)], axis=0)

    # fold BN1d (eval) into scale/bias
    scale = (bn_gamma.astype(f32) / jnp.sqrt(bn_var.astype(f32) + eps)).reshape(1, -1)
    bias = (bn_beta.astype(f32) - bn_mean.astype(f32) * scale[0]).reshape(1, -1)

    cparams = pltpu.CompilerParams(dimension_semantics=("parallel",),
                                   vmem_limit_bytes=vmem_limit_bytes)

    # --- Pallas kernel A: fused Linear + BN + ReLU over sorted point blocks ---
    point_feats = pl.pallas_call(
        _point_vfe_kernel,
        out_shape=jax.ShapeDtypeStruct((N, c_out), f32),
        grid=(N // blk,),
        in_specs=[pl.BlockSpec((blk, F_PAD), lambda i: (i, 0)),        # packed slab
                  pl.BlockSpec((F_PAD, c_out), lambda i: (0, 0)),      # weight
                  pl.BlockSpec((1, c_out), lambda i: (0, 0)),          # bn scale
                  pl.BlockSpec((1, c_out), lambda i: (0, 0))],         # bn bias
        out_specs=pl.BlockSpec((blk, c_out), lambda i: (i, 0)),
        compiler_params=cparams,
    )(packed, W_packed, scale, bias)

    # --- Pallas kernel B: per-voxel max over the sorted point features ---
    voxel_feats = pl.pallas_call(
        functools.partial(_seg_max_kernel, block_m=voxel_block, chunk=chunk),
        out_shape=jax.ShapeDtypeStruct((N, c_out), f32),
        grid_spec=pltpu.PrefetchScalarGridSpec(
            num_scalar_prefetch=1,                                     # seg_start
            grid=(N // voxel_block,),
            in_specs=[pl.BlockSpec(memory_space=pl.ANY)],              # pf stays in HBM
            out_specs=pl.BlockSpec((voxel_block, c_out), lambda i, seg: (i, 0)),
            scratch_shapes=[pltpu.VMEM((chunk, c_out), f32),           # DMA landing buf
                            pltpu.VMEM((voxel_block, c_out), f32),     # block accumulator
                            pltpu.SemaphoreType.DMA(())]),
        compiler_params=cparams,
    )(seg_start, point_feats)

    # empty (padded) voxel rows -> 0
    has_pts = (seg_start[1:] - seg_start[:-1]) > 0
    voxel_feats = jnp.where(has_pts[:, None], voxel_feats, 0.0)

    return voxel_feats, voxel_coors, num_voxels


# ----------------------------------------------------------------------------
if __name__ == "__main__":
    key = jax.random.PRNGKey(0)
    k_xyz, k_int, k_w = jax.random.split(key, 3)

    N = 1024
    C_OUT = 64
    IN_FEAT = 10   # 3 (xyz) + 3 (cluster offset) + 3 (voxel-center offset) + 1 (intensity)
    voxel_size = (0.2, 0.2, 4.0)
    pc_range = (0.0, -40.0, -3.0, 70.4, 40.0, 1.0)
    eps = 1e-3

    # sample points in a small sub-region so multiple points share voxels
    lo = jnp.array([0.0, -6.4, -3.0], jnp.float32)
    hi = jnp.array([6.4, 6.4, 1.0], jnp.float32)
    xyz = jax.random.uniform(k_xyz, (N, 3), jnp.float32, minval=lo, maxval=hi)
    intensity = jax.random.uniform(k_int, (N, 1), jnp.float32)
    features = jnp.concatenate([xyz, intensity], axis=-1)              # [N, 4]

    vx, vy, vz = voxel_size
    x0, y0, z0 = pc_range[:3]
    Dx = int(round((pc_range[3] - x0) / vx))
    Dy = int(round((pc_range[4] - y0) / vy))
    Dz = int(round((pc_range[5] - z0) / vz))
    cx = jnp.clip(jnp.floor((xyz[:, 0] - x0) / vx).astype(jnp.int32), 0, Dx - 1)
    cy = jnp.clip(jnp.floor((xyz[:, 1] - y0) / vy).astype(jnp.int32), 0, Dy - 1)
    cz = jnp.clip(jnp.floor((xyz[:, 2] - z0) / vz).astype(jnp.int32), 0, Dz - 1)
    batch_idx = (jnp.arange(N) >= N // 2).astype(jnp.int32)
    coors = jnp.stack([batch_idx, cz, cy, cx], axis=-1)                # [N, 4] (b,z,y,x)

    # deterministic parameters: Linear(10, 64, bias=False) + BN1d(64) in eval mode
    W = 0.1 * jax.random.normal(k_w, (IN_FEAT, C_OUT), jnp.float32)
    bn_gamma = 1.0 + 0.01 * jnp.arange(C_OUT, dtype=jnp.float32)
    bn_beta = 0.005 * jnp.arange(C_OUT, dtype=jnp.float32)
    bn_mean = jnp.zeros((C_OUT,), jnp.float32)
    bn_var = jnp.ones((C_OUT,), jnp.float32)

    voxel_feats, voxel_coors, num_voxels = dynamic_vfe_forward(
        features, coors, W, bn_gamma, bn_beta, bn_mean, bn_var,
        voxel_size=voxel_size, point_cloud_range=pc_range, eps=eps)
    jax.block_until_ready((voxel_feats, voxel_coors, num_voxels))

    assert voxel_feats.shape == (N, C_OUT)
    assert voxel_coors.shape == (N, 4)

    # --- pure-JAX reference (same math, no Pallas) ---
    c = coors.astype(jnp.int32)
    keys = ((c[:, 0] * Dz + c[:, 1]) * Dy + c[:, 2]) * Dx + c[:, 3]
    uniq, inv = jnp.unique(keys, return_inverse=True, size=N,
                           fill_value=jnp.iinfo(jnp.int32).max)
    vid = inv.reshape(-1).astype(jnp.int32)
    sums = jax.ops.segment_sum(
        jnp.concatenate([xyz, jnp.ones((N, 1), jnp.float32)], axis=-1), vid,
        num_segments=N)
    cc = sums[:, :3] / jnp.maximum(sums[:, 3:4], 1.0)
    cc_pt = jnp.take(cc, vid, axis=0)
    vc = jnp.stack([(c[:, 3].astype(jnp.float32) + 0.5) * vx + x0,
                    (c[:, 2].astype(jnp.float32) + 0.5) * vy + y0,
                    (c[:, 1].astype(jnp.float32) + 0.5) * vz + z0], axis=-1)
    feat10 = jnp.concatenate([xyz, xyz - cc_pt, xyz - vc, intensity], axis=-1)
    r_scale = bn_gamma / jnp.sqrt(bn_var + eps)
    r_bias = bn_beta - bn_mean * r_scale
    h = jnp.maximum(
        jnp.dot(feat10, W, precision=jax.lax.Precision.HIGHEST) * r_scale + r_bias, 0.0)
    ref = jax.ops.segment_max(h, vid, num_segments=N)
    cnt = jax.ops.segment_sum(jnp.ones((N,), jnp.int32), vid, num_segments=N)
    ref = jnp.where((cnt > 0)[:, None], ref, 0.0)
    err = float(jnp.max(jnp.abs(voxel_feats - ref)))
    assert err < 5e-3, f"max abs error vs reference: {err}"

    print("KERNEL_OK")
</pallas_src>

<mosaic_0001>
module attributes {stable_mosaic.version = 11 : i64} {
  func.func @_point_vfe_kernel(%arg0: i32, %arg1: memref<512x16xf32, #tpu.memory_space<vmem>>, %arg2: memref<16x64xf32, #tpu.memory_space<vmem>>, %arg3: memref<1x64xf32, #tpu.memory_space<vmem>>, %arg4: memref<1x64xf32, #tpu.memory_space<vmem>>, %arg5: memref<512x64xf32, #tpu.memory_space<vmem>>) attributes {dimension_semantics = [#tpu.dimension_semantics<parallel>], iteration_bounds = array<i64: 2>, scalar_prefetch = 0 : i64, scratch_operands = 0 : i64, tpu.core_type = #tpu.core_type<tc>, window_params = [{transform_indices = @transform_0, window_bounds = array<i64: 512, 16>}, {pipeline_mode = #tpu.pipeline_mode<synchronous>, transform_indices = @transform_1, window_bounds = array<i64: 16, 64>}, {pipeline_mode = #tpu.pipeline_mode<synchronous>, transform_indices = @transform_2, window_bounds = array<i64: 1, 64>}, {pipeline_mode = #tpu.pipeline_mode<synchronous>, transform_indices = @transform_3, window_bounds = array<i64: 1, 64>}, {transform_indices = @transform_4, window_bounds = array<i64: 512, 64>}]} {
    %c0 = arith.constant 0 : index
    %c0_0 = arith.constant 0 : index
    %0 = vector.load %arg1[%c0, %c0_0] : memref<512x16xf32, #tpu.memory_space<vmem>>, vector<512x16xf32>
    %c0_1 = arith.constant 0 : index
    %c0_2 = arith.constant 0 : index
    %1 = vector.load %arg2[%c0_1, %c0_2] : memref<16x64xf32, #tpu.memory_space<vmem>>, vector<16x64xf32>
    %cst = arith.constant dense<0.000000e+00> : vector<512x64xf32>
    %2 = tpu.matmul %0, %1, %cst {dimension_numbers = #tpu.dot_dimension_numbers<[1], [0], [0], [1], [0, 0, 1, 1], [], []>} : vector<512x16xf32>, vector<16x64xf32>, vector<512x64xf32> -> vector<512x64xf32>
    %c0_3 = arith.constant 0 : index
    %c0_4 = arith.constant 0 : index
    %3 = vector.load %arg3[%c0_3, %c0_4] : memref<1x64xf32, #tpu.memory_space<vmem>>, vector<1x64xf32>
    %4 = vector.broadcast %3 : vector<1x64xf32> to vector<512x64xf32>
    %5 = arith.mulf %2, %4 : vector<512x64xf32>
    %c0_5 = arith.constant 0 : index
    %c0_6 = arith.constant 0 : index
    %6 = vector.load %arg4[%c0_5, %c0_6] : memref<1x64xf32, #tpu.memory_space<vmem>>, vector<1x64xf32>
    %7 = vector.broadcast %6 : vector<1x64xf32> to vector<512x64xf32>
    %8 = arith.addf %5, %7 : vector<512x64xf32>
    %cst_7 = arith.constant 0.000000e+00 : f32
    %9 = vector.broadcast %cst_7 : f32 to vector<512x64xf32>
    %10 = arith.maximumf %8, %9 : vector<512x64xf32>
    %c0_8 = arith.constant 0 : index
    %c0_9 = arith.constant 0 : index
    %11 = vector.load %arg5[%c0_8, %c0_9] : memref<512x64xf32, #tpu.memory_space<vmem>>, vector<512x64xf32>
    tpu.vector_store %arg5[%c0_8, %c0_9], %10 {strides = array<i32>} : memref<512x64xf32, #tpu.memory_space<vmem>>, vector<512x64xf32>,
    return
  }
  func.func @transform_0(%arg0: i32) -> (i32, i32) {
    %c0_i32 = arith.constant 0 : i32
    %c0_i32_0 = arith.constant 0 : i32
    return %arg0, %c0_i32 : i32, i32
  }
  func.func @transform_1(%arg0: i32) -> (i32, i32) {
    %c0_i32 = arith.constant 0 : i32
    %c0_i32_0 = arith.constant 0 : i32
    %c0_i32_1 = arith.constant 0 : i32
    return %c0_i32, %c0_i32_0 : i32, i32
  }
  func.func @transform_2(%arg0: i32) -> (i32, i32) {
    %c0_i32 = arith.constant 0 : i32
    %c0_i32_0 = arith.constant 0 : i32
    %c0_i32_1 = arith.constant 0 : i32
    return %c0_i32, %c0_i32_0 : i32, i32
  }
  func.func @transform_3(%arg0: i32) -> (i32, i32) {
    %c0_i32 = arith.constant 0 : i32
    %c0_i32_0 = arith.constant 0 : i32
    %c0_i32_1 = arith.constant 0 : i32
    return %c0_i32, %c0_i32_0 : i32, i32
  }
  func.func @transform_4(%arg0: i32) -> (i32, i32) {
    %c0_i32 = arith.constant 0 : i32
    %c0_i32_0 = arith.constant 0 : i32
    return %arg0, %c0_i32 : i32, i32
  }
}

</mosaic_0001>

<bundles_post_ra>
// kernel: tpu_custom_call.1
= control target key start
LH: loop header
LB: loop body
LE: loop exit
PB: predicated region body
PF: predicated region fallthrough
CT: control target
= control target key end

     0   :  { %s1114_s15 = smov 0   ;;  %s1542_s0 = inlined_call_operand.vmem [shape: f32[1024,16], index: 0, kind: input, shape index: {}]   ;;  %s1543_s1 = inlined_call_operand.vmem [shape: f32[16,64], index: 1, kind: input, shape index: {}]   ;;  %s1544_s2 = inlined_call_operand.vmem [shape: f32[1,64], index: 2, kind: input, shape index: {}]   ;;  %s1545_s3 = inlined_call_operand.vmem [shape: f32[1,64], index: 3, kind: input, shape index: {}]   ;;  %s1546_s4 = inlined_call_operand.vmem [shape: f32[1024,64], index: 4, kind: output, shape index: {}]  }
   0x1 LB: > { %s990_s16 = sadd.s32 4294967295, %s1087_s15   ;;  %p994_p0 = scmp.ge.s32.totalorder %s1087_s15, 1  ;;  %s1087_s15 = sphi %s1114_s15, %s14_s15  }
   0x2   : > { %p163_p1 = scmp.lt.s32.totalorder %s1087_s15, 3 }
   0x4   : > { %p164_p2 = pnand %p994_p0, %p163_p1 }
   0x5   : > { %s995_s21 = sshll.u32 (!%p164_p2), %s990_s16, 6 }
   0x6   : > { %167 = sbr.rel (%p164_p2) target bundleno = 276 (0x114), region = 36  ;;  %p190_p3 = scmp.lt.s32.totalorder (!%p164_p2), %s995_s21, 127 }
   0xb   : > { %v266_v0 = vld [vmem:[%s1543_s1 + $0x8] sm:$0xff]  ;;  %v265_v1 = vld [vmem:[%s1543_s1] sm:$0xff]  ;;  %s1548_s21 = smov (!%p190_p3, %s995_s21), 127  ;;  %vm267_vm0 = vcmask 130048   ;;  %vm869_vm1 = vcmask 523264  }
   0xc   : > { %1066 = vmatpush.msra.mxu2 %v266_v0  ;;  %1067 = vmatpush.msra.mxu3 %v266_v0  ;;  %s996_s22 = sshll.u32 %s1548_s21, 3 }
   0xd   : > { %474 = vmatpush.msra.mxu0 %v266_v0  ;;  %1065 = vmatpush.msra.mxu1 %v266_v0  ;;  %s1136_s25 = scalar_lea.vmem %s1542_s0, %s996_s22  ;;  %s1285_s6 = scalar_lea.vmem %s1546_s4, %s996_s22 }
   0xe   : > { %1069 = vmatpush.msra.mxu2 %v265_v1  ;;  %1070 = vmatpush.msra.mxu3 %v265_v1  ;;  %v233_v2 = vld [vmem:[%s1136_s25 + $0x100] sm:$0xff]  ;;  %v234_v6 = vld [vmem:[%s1136_s25 + $0x108] sm:$0xff]  ;;  %v235_v10 = vld [vmem:[%s1136_s25 + $0x110] sm:$0xff] }
   0xf   : > { %475 = vmatpush.msra.mxu0 %v265_v1  ;;  %1068 = vmatpush.msra.mxu1 %v265_v1  ;;  %v249_v3 = vld [vmem:[%s1136_s25 + $0x180] sm:$0xff]  ;;  %v250_v7 = vld [vmem:[%s1136_s25 + $0x188] sm:$0xff]  ;;  %v251_v11 = vld [vmem:[%s1136_s25 + $0x190] sm:$0xff] }
  0x10   : > { %v201_v4 = vld [vmem:[%s1136_s25] sm:$0xff]  ;;  %1031 = vmatmul.msk.f32.vlgmr.msra.gmra.mxu2 %vm267_vm0, %v233_v2  ;;  %1047 = vmatmul.msk.f32.vlgmr.msra.gmra.mxu3 %vm267_vm0, %v249_v3  ;;  %v202_v8 = vld [vmem:[%s1136_s25 + $0x8] sm:$0xff]  ;;  %v203_v12 = vld [vmem:[%s1136_s25 + $0x10] sm:$0xff] }
  0x11   : > { %v217_v5 = vld [vmem:[%s1136_s25 + $0x80] sm:$0xff]  ;;  %999 = vmatmul.msk.f32.vlgmr.msra.gmra.mxu0 %vm267_vm0, %v201_v4  ;;  %v218_v9 = vld [vmem:[%s1136_s25 + $0x88] sm:$0xff]  ;;  %v219_v13 = vld [vmem:[%s1136_s25 + $0x90] sm:$0xff] }
  0x12   : > { %1015 = vmatmul.msk.f32.vlgmr.msra.gmra.mxu1 %vm267_vm0, %v217_v5  ;;  %v236_v14 = vld [vmem:[%s1136_s25 + $0x118] sm:$0xff]  ;;  %v237_v18 = vld [vmem:[%s1136_s25 + $0x120] sm:$0xff]  ;;  %v238_v22 = vld [vmem:[%s1136_s25 + $0x128] sm:$0xff] }
  0x13   : > { %v252_v15 = vld [vmem:[%s1136_s25 + $0x198] sm:$0xff]  ;;  %v253_v19 = vld [vmem:[%s1136_s25 + $0x1a0] sm:$0xff]  ;;  %v254_v23 = vld [vmem:[%s1136_s25 + $0x1a8] sm:$0xff] }
  0x14   : > { %v204_v16 = vld [vmem:[%s1136_s25 + $0x18] sm:$0xff]  ;;  %v205_v20 = vld [vmem:[%s1136_s25 + $0x20] sm:$0xff]  ;;  %v206_v24 = vld [vmem:[%s1136_s25 + $0x28] sm:$0xff] }
  0x15   : > { %v220_v17 = vld [vmem:[%s1136_s25 + $0x98] sm:$0xff]  ;;  %v221_v21 = vld [vmem:[%s1136_s25 + $0xa0] sm:$0xff]  ;;  %v222_v25 = vld [vmem:[%s1136_s25 + $0xa8] sm:$0xff] }
  0x16   : > { %v239_v26 = vld [vmem:[%s1136_s25 + $0x130] sm:$0xff]  ;;  %v240_v30 = vld [vmem:[%s1136_s25 + $0x138] sm:$0xff]  ;;  %v241_v34 = vld [vmem:[%s1136_s25 + $0x140] sm:$0xff] }
  0x17   : > { %v255_v27 = vld [vmem:[%s1136_s25 + $0x1b0] sm:$0xff]  ;;  %v256_v31 = vld [vmem:[%s1136_s25 + $0x1b8] sm:$0xff]  ;;  %v257_v35 = vld [vmem:[%s1136_s25 + $0x1c0] sm:$0xff] }
  0x18   : > { %1032 = vmatmul.msk.f32.gmra.mxu2 %vm267_vm0, %v234_v6  ;;  %1048 = vmatmul.msk.f32.gmra.mxu3 %vm267_vm0, %v250_v7  ;;  %v207_v28 = vld [vmem:[%s1136_s25 + $0x30] sm:$0xff]  ;;  %v208_v32 = vld [vmem:[%s1136_s25 + $0x38] sm:$0xff]  ;;  %v209_v36 = vld [vmem:[%s1136_s25 + $0x40] sm:$0xff] }
  0x19   : > { %1000 = vmatmul.msk.f32.gmra.mxu0 %vm267_vm0, %v202_v8  ;;  %v223_v29 = vld [vmem:[%s1136_s25 + $0xb0] sm:$0xff]  ;;  %v224_v33 = vld [vmem:[%s1136_s25 + $0xb8] sm:$0xff]  ;;  %v225_v37 = vld [vmem:[%s1136_s25 + $0xc0] sm:$0xff] }
  0x1a   : > { %1016 = vmatmul.msk.f32.gmra.mxu1 %vm267_vm0, %v218_v9  ;;  %v242_v38 = vld [vmem:[%s1136_s25 + $0x148] sm:$0xff]  ;;  %v243_v42 = vld [vmem:[%s1136_s25 + $0x150] sm:$0xff]  ;;  %v244_v46 = vld [vmem:[%s1136_s25 + $0x158] sm:$0xff] }
  0x1b   : > { %v258_v39 = vld [vmem:[%s1136_s25 + $0x1c8] sm:$0xff]  ;;  %v259_v43 = vld [vmem:[%s1136_s25 + $0x1d0] sm:$0xff]  ;;  %v260_v47 = vld [vmem:[%s1136_s25 + $0x1d8] sm:$0xff] }
  0x1c   : > { %v210_v40 = vld [vmem:[%s1136_s25 + $0x48] sm:$0xff]  ;;  %v211_v44 = vld [vmem:[%s1136_s25 + $0x50] sm:$0xff]  ;;  %v212_v48 = vld [vmem:[%s1136_s25 + $0x58] sm:$0xff] }
  0x1d   : > { %v226_v41 = vld [vmem:[%s1136_s25 + $0xc8] sm:$0xff]  ;;  %v227_v45 = vld [vmem:[%s1136_s25 + $0xd0] sm:$0xff]  ;;  %v228_v49 = vld [vmem:[%s1136_s25 + $0xd8] sm:$0xff] }
  0x1e   : > { %v245_v50 = vld [vmem:[%s1136_s25 + $0x160] sm:$0xff]  ;;  %v246_v54 = vld [vmem:[%s1136_s25 + $0x168] sm:$0xff]  ;;  %v247_v58 = vld [vmem:[%s1136_s25 + $0x170] sm:$0xff] }
  0x1f   : > { %v261_v51 = vld [vmem:[%s1136_s25 + $0x1e0] sm:$0xff]  ;;  %v262_v55 = vld [vmem:[%s1136_s25 + $0x1e8] sm:$0xff]  ;;  %v263_v59 = vld [vmem:[%s1136_s25 + $0x1f0] sm:$0xff] }
  0x20   : > { %1033 = vmatmul.msk.f32.gmra.mxu2 %vm267_vm0, %v235_v10  ;;  %1049 = vmatmul.msk.f32.gmra.mxu3 %vm267_vm0, %v251_v11  ;;  %v213_v52 = vld [vmem:[%s1136_s25 + $0x60] sm:$0xff]  ;;  %v214_v56 = vld [vmem:[%s1136_s25 + $0x68] sm:$0xff]  ;;  %v215_v60 = vld [vmem:[%s1136_s25 + $0x70] sm:$0xff] }
  0x21   : > { %1001 = vmatmul.msk.f32.gmra.mxu0 %vm267_vm0, %v203_v12  ;;  %v229_v53 = vld [vmem:[%s1136_s25 + $0xe0] sm:$0xff]  ;;  %v230_v57 = vld [vmem:[%s1136_s25 + $0xe8] sm:$0xff]  ;;  %v231_v61 = vld [vmem:[%s1136_s25 + $0xf0] sm:$0xff] }
  0x22   : > { %1017 = vmatmul.msk.f32.gmra.mxu1 %vm267_vm0, %v219_v13  ;;  %v248_v62 = vld [vmem:[%s1136_s25 + $0x178] sm:$0xff]  ;;  %v1269_v2 = vld [vmem:[%s1544_s2] ss:$0 sm:$0xff] }
  0x23   : > { %v264_v63 = vld [vmem:[%s1136_s25 + $0x1f8] sm:$0xff]  ;;  %v1274_v3 = vld [vmem:[%s1545_s3] ss:$0 sm:$0xff] }
  0x24   : > { %v216_v0 = vld [vmem:[%s1136_s25 + $0x78] sm:$0xff] }
  0x25   : > { %v232_v1 = vld [vmem:[%s1136_s25 + $0xf8] sm:$0xff] }
  0x28   : > { %1034 = vmatmul.msk.f32.gmra.mxu2 %vm267_vm0, %v236_v14  ;;  %1050 = vmatmul.msk.f32.gmra.mxu3 %vm267_vm0, %v252_v15 }
  0x29   : > { %1002 = vmatmul.msk.f32.gmra.mxu0 %vm267_vm0, %v204_v16 }
  0x2a   : > { %1018 = vmatmul.msk.f32.gmra.mxu1 %vm267_vm0, %v220_v17 }
  0x30   : > { %1035 = vmatmul.msk.f32.gmra.mxu2 %vm267_vm0, %v237_v18  ;;  %1051 = vmatmul.msk.f32.gmra.mxu3 %vm267_vm0, %v253_v19 }
  0x31   : > { %1003 = vmatmul.msk.f32.gmra.mxu0 %vm267_vm0, %v205_v20 }
  0x32   : > { %1019 = vmatmul.msk.f32.gmra.mxu1 %vm267_vm0, %v221_v21 }
  0x38   : > { %1036 = vmatmul.msk.f32.gmra.mxu2 %vm267_vm0, %v238_v22  ;;  %1052 = vmatmul.msk.f32.gmra.mxu3 %vm267_vm0, %v254_v23 }
  0x39   : > { %1004 = vmatmul.msk.f32.gmra.mxu0 %vm267_vm0, %v206_v24 }
  0x3a   : > { %1020 = vmatmul.msk.f32.gmra.mxu1 %vm267_vm0, %v222_v25 }
  0x40   : > { %1037 = vmatmul.msk.f32.gmra.mxu2 %vm267_vm0, %v239_v26  ;;  %1053 = vmatmul.msk.f32.gmra.mxu3 %vm267_vm0, %v255_v27 }
  0x41   : > { %1005 = vmatmul.msk.f32.gmra.mxu0 %vm267_vm0, %v207_v28 }
  0x42   : > { %1021 = vmatmul.msk.f32.gmra.mxu1 %vm267_vm0, %v223_v29 }
  0x48   : > { %1038 = vmatmul.msk.f32.gmra.mxu2 %vm267_vm0, %v240_v30  ;;  %1054 = vmatmul.msk.f32.gmra.mxu3 %vm267_vm0, %v256_v31 }
  0x49   : > { %1006 = vmatmul.msk.f32.gmra.mxu0 %vm267_vm0, %v208_v32 }
  0x4a   : > { %1022 = vmatmul.msk.f32.gmra.mxu1 %vm267_vm0, %v224_v33 }
  0x50   : > { %1039 = vmatmul.msk.f32.gmra.mxu2 %vm267_vm0, %v241_v34  ;;  %1055 = vmatmul.msk.f32.gmra.mxu3 %vm267_vm0, %v257_v35 }
  0x51   : > { %1007 = vmatmul.msk.f32.gmra.mxu0 %vm267_vm0, %v209_v36 }
  0x52   : > { %1023 = vmatmul.msk.f32.gmra.mxu1 %vm267_vm0, %v225_v37 }
  0x58   : > { %1040 = vmatmul.msk.f32.gmra.mxu2 %vm267_vm0, %v242_v38  ;;  %1056 = vmatmul.msk.f32.gmra.mxu3 %vm267_vm0, %v258_v39 }
  0x59   : > { %1008 = vmatmul.msk.f32.gmra.mxu0 %vm267_vm0, %v210_v40 }
  0x5a   : > { %1024 = vmatmul.msk.f32.gmra.mxu1 %vm267_vm0, %v226_v41 }
  0x60   : > { %1041 = vmatmul.msk.f32.gmra.mxu2 %vm267_vm0, %v243_v42  ;;  %1057 = vmatmul.msk.f32.gmra.mxu3 %vm267_vm0, %v259_v43 }
  0x61   : > { %1009 = vmatmul.msk.f32.gmra.mxu0 %vm267_vm0, %v211_v44 }
  0x62   : > { %1025 = vmatmul.msk.f32.gmra.mxu1 %vm267_vm0, %v227_v45 }
  0x68   : > { %1042 = vmatmul.msk.f32.gmra.mxu2 %vm267_vm0, %v244_v46  ;;  %1058 = vmatmul.msk.f32.gmra.mxu3 %vm267_vm0, %v260_v47 }
  0x69   : > { %1010 = vmatmul.msk.f32.gmra.mxu0 %vm267_vm0, %v212_v48 }
  0x6a   : > { %1026 = vmatmul.msk.f32.gmra.mxu1 %vm267_vm0, %v228_v49 }
  0x70   : > { %1043 = vmatmul.msk.f32.gmra.mxu2 %vm267_vm0, %v245_v50  ;;  %1059 = vmatmul.msk.f32.gmra.mxu3 %vm267_vm0, %v261_v51 }
  0x71   : > { %1011 = vmatmul.msk.f32.gmra.mxu0 %vm267_vm0, %v213_v52 }
  0x72   : > { %1027 = vmatmul.msk.f32.gmra.mxu1 %vm267_vm0, %v229_v53 }
  0x78   : > { %1044 = vmatmul.msk.f32.gmra.mxu2 %vm267_vm0, %v246_v54  ;;  %1060 = vmatmul.msk.f32.gmra.mxu3 %vm267_vm0, %v262_v55 }
  0x79   : > { %1012 = vmatmul.msk.f32.gmra.mxu0 %vm267_vm0, %v214_v56 }
  0x7a   : > { %1028 = vmatmul.msk.f32.gmra.mxu1 %vm267_vm0, %v230_v57 }
  0x80   : > { %1045 = vmatmul.msk.f32.gmra.mxu2 %vm267_vm0, %v247_v58  ;;  %1061 = vmatmul.msk.f32.gmra.mxu3 %vm267_vm0, %v263_v59 }
  0x81   : > { %1013 = vmatmul.msk.f32.gmra.mxu0 %vm267_vm0, %v215_v60 }
  0x82   : > { %1029 = vmatmul.msk.f32.gmra.mxu1 %vm267_vm0, %v231_v61 }
  0x88   : > { %1046 = vmatmul.msk.f32.gmra.mxu2 %vm267_vm0, %v248_v62  ;;  %1062 = vmatmul.msk.f32.gmra.mxu3 %vm267_vm0, %v264_v63 }
  0x89   : > { %1014 = vmatmul.msk.f32.gmra.mxu0 %vm267_vm0, %v216_v0 }
  0x8a   : > { %1030 = vmatmul.msk.f32.gmra.mxu1 %vm267_vm0, %v232_v1 }
  0x8e   : > { %v477_v4 = vpop.f32.mrf.mxu0 }
  0x8f   : > { %v525_v5 = vpop.f32.mrf.mxu1  ;;  %v673_v6 = vmul.f32 %v1269_v2, %v477_v4 }
  0x90   : > { %v689_v7 = vmul.f32 %v1269_v2, %v525_v5 }
  0x91   : > { %v741_v8 = vadd.f32 %v1274_v3, %v673_v6 }
  0x92   : > { %v757_v9 = vadd.f32 %v1274_v3, %v689_v7 }
  0x93   : > { %v805_v10 = vmax.f32 %v741_v8, 0.0  ;;  %v573_v12 = vpop.f32.mrf.mxu2  ;;  %v621_v13 = vpop.f32.mrf.mxu3 }
  0x94   : > { %v821_v11 = vmax.f32 %v757_v9, 0.0  ;;  %v705_v14 = vmul.f32 %v1269_v2, %v573_v12  ;;  %v721_v15 = vmul.f32 %v1269_v2, %v621_v13 }
  0x95   : > { %870 = vst.msk [vmem:[%s1285_s6] sm:$0xff] %vm869_vm1, %v805_v10 }
  0x96   : > { %886 = vst.msk [vmem:[%s1285_s6 + $0x80] sm:$0xff] %vm869_vm1, %v821_v11  ;;  %v773_v16 = vadd.f32 %v1274_v3, %v705_v14  ;;  %v789_v17 = vadd.f32 %v1274_v3, %v721_v15  ;;  %v480_v18 = vpop.f32.mrf.mxu0 }
  0x97   : > { %v528_v19 = vpop.f32.mrf.mxu1  ;;  %v674_v20 = vmul.f32 %v1269_v2, %v480_v18 }
  0x98   : > { %v690_v21 = vmul.f32 %v1269_v2, %v528_v19  ;;  %v837_v22 = vmax.f32 %v773_v16, 0.0  ;;  %v853_v23 = vmax.f32 %v789_v17, 0.0 }
  0x99   : > { %v742_v24 = vadd.f32 %v1274_v3, %v674_v20 }
  0x9a   : > { %v758_v25 = vadd.f32 %v1274_v3, %v690_v21  ;;  %902 = vst.msk [vmem:[%s1285_s6 + $0x100] sm:$0xff] %vm869_vm1, %v837_v22 }
  0x9b   : > { %918 = vst.msk [vmem:[%s1285_s6 + $0x180] sm:$0xff] %vm869_vm1, %v853_v23  ;;  %v806_v26 = vmax.f32 %v742_v24, 0.0  ;;  %v576_v28 = vpop.f32.mrf.mxu2  ;;  %v624_v29 = vpop.f32.mrf.mxu3 }
  0x9c   : > { %v822_v27 = vmax.f32 %v758_v25, 0.0  ;;  %v706_v30 = vmul.f32 %v1269_v2, %v576_v28  ;;  %v722_v31 = vmul.f32 %v1269_v2, %v624_v29 }
  0x9d   : > { %871 = vst.msk [vmem:[%s1285_s6 + $0x8] sm:$0xff] %vm869_vm1, %v806_v26 }
  0x9e   : > { %887 = vst.msk [vmem:[%s1285_s6 + $0x88] sm:$0xff] %vm869_vm1, %v822_v27  ;;  %v774_v32 = vadd.f32 %v1274_v3, %v706_v30  ;;  %v790_v33 = vadd.f32 %v1274_v3, %v722_v31  ;;  %v483_v34 = vpop.f32.mrf.mxu0 }
  0x9f   : > { %v531_v35 = vpop.f32.mrf.mxu1  ;;  %v675_v36 = vmul.f32 %v1269_v2, %v483_v34 }
  0xa0   : > { %v691_v37 = vmul.f32 %v1269_v2, %v531_v35  ;;  %v838_v38 = vmax.f32 %v774_v32, 0.0  ;;  %v854_v39 = vmax.f32 %v790_v33, 0.0 }
  0xa1   : > { %v743_v40 = vadd.f32 %v1274_v3, %v675_v36 }
  0xa2   : > { %v759_v41 = vadd.f32 %v1274_v3, %v691_v37  ;;  %903 = vst.msk [vmem:[%s1285_s6 + $0x108] sm:$0xff] %vm869_vm1, %v838_v38 }
  0xa3   : > { %919 = vst.msk [vmem:[%s1285_s6 + $0x188] sm:$0xff] %vm869_vm1, %v854_v39  ;;  %v807_v42 = vmax.f32 %v743_v40, 0.0  ;;  %v579_v44 = vpop.f32.mrf.mxu2  ;;  %v627_v45 = vpop.f32.mrf.mxu3 }
  0xa4   : > { %v823_v43 = vmax.f32 %v759_v41, 0.0  ;;  %v707_v46 = vmul.f32 %v1269_v2, %v579_v44  ;;  %v723_v47 = vmul.f32 %v1269_v2, %v627_v45 }
  0xa5   : > { %872 = vst.msk [vmem:[%s1285_s6 + $0x10] sm:$0xff] %vm869_vm1, %v807_v42 }
  0xa6   : > { %888 = vst.msk [vmem:[%s1285_s6 + $0x90] sm:$0xff] %vm869_vm1, %v823_v43  ;;  %v775_v48 = vadd.f32 %v1274_v3, %v707_v46  ;;  %v791_v49 = vadd.f32 %v1274_v3, %v723_v47  ;;  %v486_v50 = vpop.f32.mrf.mxu0 }
  0xa7   : > { %v534_v51 = vpop.f32.mrf.mxu1  ;;  %v676_v52 = vmul.f32 %v1269_v2, %v486_v50 }
  0xa8   : > { %v692_v53 = vmul.f32 %v1269_v2, %v534_v51  ;;  %v839_v54 = vmax.f32 %v775_v48, 0.0  ;;  %v855_v55 = vmax.f32 %v791_v49, 0.0 }
  0xa9   : > { %v744_v56 = vadd.f32 %v1274_v3, %v676_v52 }
  0xaa   : > { %v760_v57 = vadd.f32 %v1274_v3, %v692_v53  ;;  %904 = vst.msk [vmem:[%s1285_s6 + $0x110] sm:$0xff] %vm869_vm1, %v839_v54 }
  0xab   : > { %920 = vst.msk [vmem:[%s1285_s6 + $0x190] sm:$0xff] %vm869_vm1, %v855_v55  ;;  %v808_v58 = vmax.f32 %v744_v56, 0.0  ;;  %v582_v60 = vpop.f32.mrf.mxu2  ;;  %v630_v61 = vpop.f32.mrf.mxu3 }
  0xac   : > { %v824_v59 = vmax.f32 %v760_v57, 0.0  ;;  %v708_v62 = vmul.f32 %v1269_v2, %v582_v60  ;;  %v724_v63 = vmul.f32 %v1269_v2, %v630_v61 }
  0xad   : > { %873 = vst.msk [vmem:[%s1285_s6 + $0x18] sm:$0xff] %vm869_vm1, %v808_v58 }
  0xae   : > { %889 = vst.msk [vmem:[%s1285_s6 + $0x98] sm:$0xff] %vm869_vm1, %v824_v59  ;;  %v776_v0 = vadd.f32 %v1274_v3, %v708_v62  ;;  %v792_v1 = vadd.f32 %v1274_v3, %v724_v63  ;;  %v489_v4 = vpop.f32.mrf.mxu0 }
  0xaf   : > { %v537_v5 = vpop.f32.mrf.mxu1  ;;  %v677_v6 = vmul.f32 %v1269_v2, %v489_v4 }
  0xb0   : > { %v693_v7 = vmul.f32 %v1269_v2, %v537_v5  ;;  %v840_v8 = vmax.f32 %v776_v0, 0.0  ;;  %v856_v9 = vmax.f32 %v792_v1, 0.0 }
  0xb1   : > { %v745_v10 = vadd.f32 %v1274_v3, %v677_v6 }
  0xb2   : > { %v761_v11 = vadd.f32 %v1274_v3, %v693_v7  ;;  %905 = vst.msk [vmem:[%s1285_s6 + $0x118] sm:$0xff] %vm869_vm1, %v840_v8 }
  0xb3   : > { %921 = vst.msk [vmem:[%s1285_s6 + $0x198] sm:$0xff] %vm869_vm1, %v856_v9  ;;  %v809_v12 = vmax.f32 %v745_v10, 0.0  ;;  %v585_v14 = vpop.f32.mrf.mxu2  ;;  %v633_v15 = vpop.f32.mrf.mxu3 }
  0xb4   : > { %v825_v13 = vmax.f32 %v761_v11, 0.0  ;;  %v709_v16 = vmul.f32 %v1269_v2, %v585_v14  ;;  %v725_v17 = vmul.f32 %v1269_v2, %v633_v15 }
  0xb5   : > { %874 = vst.msk [vmem:[%s1285_s6 + $0x20] sm:$0xff] %vm869_vm1, %v809_v12 }
  0xb6   : > { %890 = vst.msk [vmem:[%s1285_s6 + $0xa0] sm:$0xff] %vm869_vm1, %v825_v13  ;;  %v777_v18 = vadd.f32 %v1274_v3, %v709_v16  ;;  %v793_v19 = vadd.f32 %v1274_v3, %v725_v17  ;;  %v492_v20 = vpop.f32.mrf.mxu0 }
  0xb7   : > { %v540_v21 = vpop.f32.mrf.mxu1  ;;  %v678_v22 = vmul.f32 %v1269_v2, %v492_v20 }
  0xb8   : > { %v694_v23 = vmul.f32 %v1269_v2, %v540_v21  ;;  %v841_v24 = vmax.f32 %v777_v18, 0.0  ;;  %v857_v25 = vmax.f32 %v793_v19, 0.0 }
  0xb9   : > { %v746_v26 = vadd.f32 %v1274_v3, %v678_v22 }
  0xba   : > { %v762_v27 = vadd.f32 %v1274_v3, %v694_v23  ;;  %906 = vst.msk [vmem:[%s1285_s6 + $0x120] sm:$0xff] %vm869_vm1, %v841_v24 }
  0xbb   : > { %922 = vst.msk [vmem:[%s1285_s6 + $0x1a0] sm:$0xff] %vm869_vm1, %v857_v25  ;;  %v810_v28 = vmax.f32 %v746_v26, 0.0  ;;  %v588_v30 = vpop.f32.mrf.mxu2  ;;  %v636_v31 = vpop.f32.mrf.mxu3 }
  0xbc   : > { %v826_v29 = vmax.f32 %v762_v27, 0.0  ;;  %v710_v32 = vmul.f32 %v1269_v2, %v588_v30  ;;  %v726_v33 = vmul.f32 %v1269_v2, %v636_v31 }
  0xbd   : > { %875 = vst.msk [vmem:[%s1285_s6 + $0x28] sm:$0xff] %vm869_vm1, %v810_v28 }
  0xbe   : > { %891 = vst.msk [vmem:[%s1285_s6 + $0xa8] sm:$0xff] %vm869_vm1, %v826_v29  ;;  %v778_v34 = vadd.f32 %v1274_v3, %v710_v32  ;;  %v794_v35 = vadd.f32 %v1274_v3, %v726_v33  ;;  %v495_v36 = vpop.f32.mrf.mxu0 }
  0xbf   : > { %v543_v37 = vpop.f32.mrf.mxu1  ;;  %v679_v38 = vmul.f32 %v1269_v2, %v495_v36 }
  0xc0   : > { %v695_v39 = vmul.f32 %v1269_v2, %v543_v37  ;;  %v842_v40 = vmax.f32 %v778_v34, 0.0  ;;  %v858_v41 = vmax.f32 %v794_v35, 0.0 }
  0xc1   : > { %v747_v42 = vadd.f32 %v1274_v3, %v679_v38 }
  0xc2   : > { %v763_v43 = vadd.f32 %v1274_v3, %v695_v39  ;;  %907 = vst.msk [vmem:[%s1285_s6 + $0x128] sm:$0xff] %vm869_vm1, %v842_v40 }
  0xc3   : > { %923 = vst.msk [vmem:[%s1285_s6 + $0x1a8] sm:$0xff] %vm869_vm1, %v858_v41  ;;  %v811_v44 = vmax.f32 %v747_v42, 0.0  ;;  %v591_v46 = vpop.f32.mrf.mxu2  ;;  %v639_v47 = vpop.f32.mrf.mxu3 }
  0xc4   : > { %v827_v45 = vmax.f32 %v763_v43, 0.0  ;;  %v711_v48 = vmul.f32 %v1269_v2, %v591_v46  ;;  %v727_v49 = vmul.f32 %v1269_v2, %v639_v47 }
  0xc5   : > { %876 = vst.msk [vmem:[%s1285_s6 + $0x30] sm:$0xff] %vm869_vm1, %v811_v44 }
  0xc6   : > { %892 = vst.msk [vmem:[%s1285_s6 + $0xb0] sm:$0xff] %vm869_vm1, %v827_v45  ;;  %v779_v50 = vadd.f32 %v1274_v3, %v711_v48  ;;  %v795_v51 = vadd.f32 %v1274_v3, %v727_v49  ;;  %v498_v52 = vpop.f32.mrf.mxu0 }
  0xc7   : > { %v546_v53 = vpop.f32.mrf.mxu1  ;;  %v680_v54 = vmul.f32 %v1269_v2, %v498_v52 }
  0xc8   : > { %v696_v55 = vmul.f32 %v1269_v2, %v546_v53  ;;  %v843_v56 = vmax.f32 %v779_v50, 0.0  ;;  %v859_v57 = vmax.f32 %v795_v51, 0.0 }
  0xc9   : > { %v748_v58 = vadd.f32 %v1274_v3, %v680_v54 }
  0xca   : > { %v764_v59 = vadd.f32 %v1274_v3, %v696_v55  ;;  %908 = vst.msk [vmem:[%s1285_s6 + $0x130] sm:$0xff] %vm869_vm1, %v843_v56 }
  0xcb   : > { %924 = vst.msk [vmem:[%s1285_s6 + $0x1b0] sm:$0xff] %vm869_vm1, %v859_v57  ;;  %v812_v60 = vmax.f32 %v748_v58, 0.0  ;;  %v594_v62 = vpop.f32.mrf.mxu2  ;;  %v642_v63 = vpop.f32.mrf.mxu3 }
  0xcc   : > { %v828_v61 = vmax.f32 %v764_v59, 0.0  ;;  %v712_v0 = vmul.f32 %v1269_v2, %v594_v62  ;;  %v728_v1 = vmul.f32 %v1269_v2, %v642_v63 }
  0xcd   : > { %877 = vst.msk [vmem:[%s1285_s6 + $0x38] sm:$0xff] %vm869_vm1, %v812_v60 }
  0xce   : > { %893 = vst.msk [vmem:[%s1285_s6 + $0xb8] sm:$0xff] %vm869_vm1, %v828_v61  ;;  %v780_v4 = vadd.f32 %v1274_v3, %v712_v0  ;;  %v796_v5 = vadd.f32 %v1274_v3, %v728_v1  ;;  %v501_v6 = vpop.f32.mrf.mxu0 }
  0xcf   : > { %v549_v7 = vpop.f32.mrf.mxu1  ;;  %v681_v8 = vmul.f32 %v1269_v2, %v501_v6 }
  0xd0   : > { %v697_v9 = vmul.f32 %v1269_v2, %v549_v7  ;;  %v844_v10 = vmax.f32 %v780_v4, 0.0  ;;  %v860_v11 = vmax.f32 %v796_v5, 0.0 }
  0xd1   : > { %v749_v12 = vadd.f32 %v1274_v3, %v681_v8 }
  0xd2   : > { %v765_v13 = vadd.f32 %v1274_v3, %v697_v9  ;;  %909 = vst.msk [vmem:[%s1285_s6 + $0x138] sm:$0xff] %vm869_vm1, %v844_v10 }
  0xd3   : > { %925 = vst.msk [vmem:[%s1285_s6 + $0x1b8] sm:$0xff] %vm869_vm1, %v860_v11  ;;  %v813_v14 = vmax.f32 %v749_v12, 0.0  ;;  %v597_v16 = vpop.f32.mrf.mxu2  ;;  %v645_v17 = vpop.f32.mrf.mxu3 }
  0xd4   : > { %v829_v15 = vmax.f32 %v765_v13, 0.0  ;;  %v713_v18 = vmul.f32 %v1269_v2, %v597_v16  ;;  %v729_v19 = vmul.f32 %v1269_v2, %v645_v17 }
  0xd5   : > { %878 = vst.msk [vmem:[%s1285_s6 + $0x40] sm:$0xff] %vm869_vm1, %v813_v14 }
  0xd6   : > { %894 = vst.msk [vmem:[%s1285_s6 + $0xc0] sm:$0xff] %vm869_vm1, %v829_v15  ;;  %v781_v20 = vadd.f32 %v1274_v3, %v713_v18  ;;  %v797_v21 = vadd.f32 %v1274_v3, %v729_v19  ;;  %v504_v22 = vpop.f32.mrf.mxu0 }
  0xd7   : > { %v552_v23 = vpop.f32.mrf.mxu1  ;;  %v682_v24 = vmul.f32 %v1269_v2, %v504_v22 }
  0xd8   : > { %v698_v25 = vmul.f32 %v1269_v2, %v552_v23  ;;  %v845_v26 = vmax.f32 %v781_v20, 0.0  ;;  %v861_v27 = vmax.f32 %v797_v21, 0.0 }
  0xd9   : > { %v750_v28 = vadd.f32 %v1274_v3, %v682_v24 }
  0xda   : > { %v766_v29 = vadd.f32 %v1274_v3, %v698_v25  ;;  %910 = vst.msk [vmem:[%s1285_s6 + $0x140] sm:$0xff] %vm869_vm1, %v845_v26 }
  0xdb   : > { %926 = vst.msk [vmem:[%s1285_s6 + $0x1c0] sm:$0xff] %vm869_vm1, %v861_v27  ;;  %v814_v30 = vmax.f32 %v750_v28, 0.0  ;;  %v600_v32 = vpop.f32.mrf.mxu2  ;;  %v648_v33 = vpop.f32.mrf.mxu3 }
  0xdc   : > { %v830_v31 = vmax.f32 %v766_v29, 0.0  ;;  %v714_v34 = vmul.f32 %v1269_v2, %v600_v32  ;;  %v730_v35 = vmul.f32 %v1269_v2, %v648_v33 }
  0xdd   : > { %879 = vst.msk [vmem:[%s1285_s6 + $0x48] sm:$0xff] %vm869_vm1, %v814_v30 }
  0xde   : > { %895 = vst.msk [vmem:[%s1285_s6 + $0xc8] sm:$0xff] %vm869_vm1, %v830_v31  ;;  %v782_v36 = vadd.f32 %v1274_v3, %v714_v34  ;;  %v798_v37 = vadd.f32 %v1274_v3, %v730_v35  ;;  %v507_v38 = vpop.f32.mrf.mxu0 }
  0xdf   : > { %v555_v39 = vpop.f32.mrf.mxu1  ;;  %v683_v40 = vmul.f32 %v1269_v2, %v507_v38 }
  0xe0   : > { %v699_v41 = vmul.f32 %v1269_v2, %v555_v39  ;;  %v846_v42 = vmax.f32 %v782_v36, 0.0  ;;  %v862_v43 = vmax.f32 %v798_v37, 0.0 }
  0xe1   : > { %v751_v44 = vadd.f32 %v1274_v3, %v683_v40 }
  0xe2   : > { %v767_v45 = vadd.f32 %v1274_v3, %v699_v41  ;;  %911 = vst.msk [vmem:[%s1285_s6 + $0x148] sm:$0xff] %vm869_vm1, %v846_v42 }
  0xe3   : > { %927 = vst.msk [vmem:[%s1285_s6 + $0x1c8] sm:$0xff] %vm869_vm1, %v862_v43  ;;  %v815_v46 = vmax.f32 %v751_v44, 0.0  ;;  %v603_v48 = vpop.f32.mrf.mxu2  ;;  %v651_v49 = vpop.f32.mrf.mxu3 }
  0xe4   : > { %v831_v47 = vmax.f32 %v767_v45, 0.0  ;;  %v715_v50 = vmul.f32 %v1269_v2, %v603_v48  ;;  %v731_v51 = vmul.f32 %v1269_v2, %v651_v49 }
  0xe5   : > { %880 = vst.msk [vmem:[%s1285_s6 + $0x50] sm:$0xff] %vm869_vm1, %v815_v46 }
  0xe6   : > { %896 = vst.msk [vmem:[%s1285_s6 + $0xd0] sm:$0xff] %vm869_vm1, %v831_v47  ;;  %v783_v52 = vadd.f32 %v1274_v3, %v715_v50  ;;  %v799_v53 = vadd.f32 %v1274_v3, %v731_v51  ;;  %v510_v54 = vpop.f32.mrf.mxu0 }
  0xe7   : > { %v558_v55 = vpop.f32.mrf.mxu1  ;;  %v684_v56 = vmul.f32 %v1269_v2, %v510_v54 }
  0xe8   : > { %v700_v57 = vmul.f32 %v1269_v2, %v558_v55  ;;  %v847_v58 = vmax.f32 %v783_v52, 0.0  ;;  %v863_v59 = vmax.f32 %v799_v53, 0.0 }
  0xe9   : > { %v752_v60 = vadd.f32 %v1274_v3, %v684_v56 }
  0xea   : > { %v768_v61 = vadd.f32 %v1274_v3, %v700_v57  ;;  %912 = vst.msk [vmem:[%s1285_s6 + $0x150] sm:$0xff] %vm869_vm1, %v847_v58 }
  0xeb   : > { %928 = vst.msk [vmem:[%s1285_s6 + $0x1d0] sm:$0xff] %vm869_vm1, %v863_v59  ;;  %v816_v62 = vmax.f32 %v752_v60, 0.0  ;;  %v606_v0 = vpop.f32.mrf.mxu2  ;;  %v654_v1 = vpop.f32.mrf.mxu3 }
  0xec   : > { %v832_v63 = vmax.f32 %v768_v61, 0.0  ;;  %v716_v4 = vmul.f32 %v1269_v2, %v606_v0  ;;  %v732_v5 = vmul.f32 %v1269_v2, %v654_v1 }
  0xed   : > { %881 = vst.msk [vmem:[%s1285_s6 + $0x58] sm:$0xff] %vm869_vm1, %v816_v62 }
  0xee   : > { %897 = vst.msk [vmem:[%s1285_s6 + $0xd8] sm:$0xff] %vm869_vm1, %v832_v63  ;;  %v784_v6 = vadd.f32 %v1274_v3, %v716_v4  ;;  %v800_v7 = vadd.f32 %v1274_v3, %v732_v5  ;;  %v513_v8 = vpop.f32.mrf.mxu0 }
  0xef   : > { %v561_v9 = vpop.f32.mrf.mxu1  ;;  %v685_v10 = vmul.f32 %v1269_v2, %v513_v8 }
  0xf0   : > { %v701_v11 = vmul.f32 %v1269_v2, %v561_v9  ;;  %v848_v12 = vmax.f32 %v784_v6, 0.0  ;;  %v864_v13 = vmax.f32 %v800_v7, 0.0 }
  0xf1   : > { %v753_v14 = vadd.f32 %v1274_v3, %v685_v10 }
  0xf2   : > { %v769_v15 = vadd.f32 %v1274_v3, %v701_v11  ;;  %913 = vst.msk [vmem:[%s1285_s6 + $0x158] sm:$0xff] %vm869_vm1, %v848_v12 }
  0xf3   : > { %929 = vst.msk [vmem:[%s1285_s6 + $0x1d8] sm:$0xff] %vm869_vm1, %v864_v13  ;;  %v817_v16 = vmax.f32 %v753_v14, 0.0  ;;  %v609_v18 = vpop.f32.mrf.mxu2  ;;  %v657_v19 = vpop.f32.mrf.mxu3 }
  0xf4   : > { %v833_v17 = vmax.f32 %v769_v15, 0.0  ;;  %v717_v20 = vmul.f32 %v1269_v2, %v609_v18  ;;  %v733_v21 = vmul.f32 %v1269_v2, %v657_v19 }
  0xf5   : > { %882 = vst.msk [vmem:[%s1285_s6 + $0x60] sm:$0xff] %vm869_vm1, %v817_v16 }
  0xf6   : > { %898 = vst.msk [vmem:[%s1285_s6 + $0xe0] sm:$0xff] %vm869_vm1, %v833_v17  ;;  %v785_v22 = vadd.f32 %v1274_v3, %v717_v20  ;;  %v801_v23 = vadd.f32 %v1274_v3, %v733_v21  ;;  %v516_v24 = vpop.f32.mrf.mxu0 }
  0xf7   : > { %v564_v25 = vpop.f32.mrf.mxu1  ;;  %v686_v26 = vmul.f32 %v1269_v2, %v516_v24 }
  0xf8   : > { %v702_v27 = vmul.f32 %v1269_v2, %v564_v25  ;;  %v849_v28 = vmax.f32 %v785_v22, 0.0  ;;  %v865_v29 = vmax.f32 %v801_v23, 0.0 }
  0xf9   : > { %v754_v30 = vadd.f32 %v1274_v3, %v686_v26 }
  0xfa   : > { %v770_v31 = vadd.f32 %v1274_v3, %v702_v27  ;;  %914 = vst.msk [vmem:[%s1285_s6 + $0x160] sm:$0xff] %vm869_vm1, %v849_v28 }
  0xfb   : > { %930 = vst.msk [vmem:[%s1285_s6 + $0x1e0] sm:$0xff] %vm869_vm1, %v865_v29  ;;  %v818_v32 = vmax.f32 %v754_v30, 0.0  ;;  %v612_v34 = vpop.f32.mrf.mxu2  ;;  %v660_v35 = vpop.f32.mrf.mxu3 }
  0xfc   : > { %v834_v33 = vmax.f32 %v770_v31, 0.0  ;;  %v718_v36 = vmul.f32 %v1269_v2, %v612_v34  ;;  %v734_v37 = vmul.f32 %v1269_v2, %v660_v35 }
  0xfd   : > { %883 = vst.msk [vmem:[%s1285_s6 + $0x68] sm:$0xff] %vm869_vm1, %v818_v32 }
  0xfe   : > { %899 = vst.msk [vmem:[%s1285_s6 + $0xe8] sm:$0xff] %vm869_vm1, %v834_v33  ;;  %v786_v38 = vadd.f32 %v1274_v3, %v718_v36  ;;  %v802_v39 = vadd.f32 %v1274_v3, %v734_v37  ;;  %v519_v40 = vpop.f32.mrf.mxu0 }
  0xff   : > { %v567_v41 = vpop.f32.mrf.mxu1  ;;  %v687_v42 = vmul.f32 %v1269_v2, %v519_v40 }
 0x100   : > { %v703_v43 = vmul.f32 %v1269_v2, %v567_v41  ;;  %v850_v44 = vmax.f32 %v786_v38, 0.0  ;;  %v866_v45 = vmax.f32 %v802_v39, 0.0 }
 0x101   : > { %v755_v46 = vadd.f32 %v1274_v3, %v687_v42 }
 0x102   : > { %v771_v47 = vadd.f32 %v1274_v3, %v703_v43  ;;  %915 = vst.msk [vmem:[%s1285_s6 + $0x168] sm:$0xff] %vm869_vm1, %v850_v44 }
 0x103   : > { %931 = vst.msk [vmem:[%s1285_s6 + $0x1e8] sm:$0xff] %vm869_vm1, %v866_v45  ;;  %v819_v48 = vmax.f32 %v755_v46, 0.0  ;;  %v615_v50 = vpop.f32.mrf.mxu2  ;;  %v663_v51 = vpop.f32.mrf.mxu3 }
 0x104   : > { %v835_v49 = vmax.f32 %v771_v47, 0.0  ;;  %v719_v52 = vmul.f32 %v1269_v2, %v615_v50  ;;  %v735_v53 = vmul.f32 %v1269_v2, %v663_v51 }
 0x105   : > { %884 = vst.msk [vmem:[%s1285_s6 + $0x70] sm:$0xff] %vm869_vm1, %v819_v48 }
 0x106   : > { %900 = vst.msk [vmem:[%s1285_s6 + $0xf0] sm:$0xff] %vm869_vm1, %v835_v49  ;;  %v787_v54 = vadd.f32 %v1274_v3, %v719_v52  ;;  %v803_v55 = vadd.f32 %v1274_v3, %v735_v53  ;;  %v522_v56 = vpop.f32.mrf.mxu0 }
 0x107   : > { %v570_v57 = vpop.f32.mrf.mxu1  ;;  %v688_v58 = vmul.f32 %v1269_v2, %v522_v56 }
 0x108   : > { %v704_v59 = vmul.f32 %v1269_v2, %v570_v57  ;;  %v851_v60 = vmax.f32 %v787_v54, 0.0  ;;  %v867_v61 = vmax.f32 %v803_v55, 0.0 }
 0x109   : > { %v756_v62 = vadd.f32 %v1274_v3, %v688_v58 }
 0x10a   : > { %v772_v63 = vadd.f32 %v1274_v3, %v704_v59  ;;  %916 = vst.msk [vmem:[%s1285_s6 + $0x170] sm:$0xff] %vm869_vm1, %v851_v60 }
 0x10b   : > { %932 = vst.msk [vmem:[%s1285_s6 + $0x1f0] sm:$0xff] %vm869_vm1, %v867_v61  ;;  %v820_v0 = vmax.f32 %v756_v62, 0.0  ;;  %v618_v4 = vpop.f32.mrf.mxu2  ;;  %v666_v5 = vpop.f32.mrf.mxu3 }
 0x10c   : > { %v836_v1 = vmax.f32 %v772_v63, 0.0  ;;  %v720_v6 = vmul.f32 %v1269_v2, %v618_v4  ;;  %v736_v7 = vmul.f32 %v1269_v2, %v666_v5 }
 0x10d   : > { %885 = vst.msk [vmem:[%s1285_s6 + $0x78] sm:$0xff] %vm869_vm1, %v820_v0 }
 0x10e   : > { %901 = vst.msk [vmem:[%s1285_s6 + $0xf8] sm:$0xff] %vm869_vm1, %v836_v1  ;;  %v788_v8 = vadd.f32 %v1274_v3, %v720_v6  ;;  %v804_v9 = vadd.f32 %v1274_v3, %v736_v7 }
 0x110   : > { %v852_v10 = vmax.f32 %v788_v8, 0.0  ;;  %v868_v11 = vmax.f32 %v804_v9, 0.0 }
 0x112   : > { %917 = vst.msk [vmem:[%s1285_s6 + $0x178] sm:$0xff] %vm869_vm1, %v852_v10 }
 0x113   : > { %933 = vst.msk [vmem:[%s1285_s6 + $0x1f8] sm:$0xff] %vm869_vm1, %v868_v11 }
 0x114 PF: > { %s14_s15 = sadd.s32 1, %s1087_s15  }
 0x115   : > { %p11_p4 = scmp.ge.s32.totalorder %s14_s15, 4  }
 0x117   :  { %13 = sbr.rel (!%p11_p4) target bundleno = 1 (0x1), region = 66 }

</bundles_post_ra>
